<compile_context>
chip_gen: v6e
topology: v6e:2x2x1
jax: 0.10.0
libtpu: 0.0.40
codegen_flags: <defaults>
</compile_context>

<pallas_src>
import math

import numpy as np
import jax
import jax.numpy as jnp
from jax.experimental import pallas as pl
from jax.experimental.pallas import tpu as pltpu


def _round_up(x, m):
    return -(-x // m) * m


# ----------------------------------------------------------------------------
# Pallas kernel: out = ReLU( W_feats @ x + prior ); bias is pre-folded in prior.
#   w_ref     : (Coutp, C)       bf16  (resident across the grid)
#   x_ref     : (C, tile_p)      bf16  (NCHW pixels of one image tile)
#   prior_ref : (Coutp, tile_p)  bf16  (low-rank pyramid term + bias)
#   o_ref     : (Coutp, tile_p)  f32   (NCHW output tile)
# ----------------------------------------------------------------------------
def _bottleneck_kernel(w_ref, x_ref, prior_ref, o_ref):
    acc = jnp.dot(w_ref[...], x_ref[...], preferred_element_type=jnp.float32)
    o_ref[...] = jnp.maximum(acc + prior_ref[...].astype(jnp.float32),
                             0.0).astype(o_ref.dtype)


def _pick_tile_p(P, N, cap=2048, min_steps=4):
    """Pixel-tile (lane) size: a divisor of P that is a multiple of 128 (so no
    padding pass is needed), as large as possible (<= cap) while keeping at
    least `min_steps` total grid steps (>= 2 per v7x TensorCore).  Falls back to
    the full pixel axis when P has no 128-multiple divisor (legal: the block
    then equals the array dim; this is the small-demo case)."""
    cands = [d for d in range(128, min(P, cap) + 1, 128) if P % d == 0]
    if not cands:
        return P
    good = [d for d in cands if N * (P // d) >= min_steps]
    return max(good) if good else min(cands)


def _vmem_limit_bytes(tile_p, C, Coutp):
    # actual per-step buffers (x + prior + out tiles + resident weight),
    # double-buffered by the Pallas pipeline, plus headroom for internal
    # scratch; capped at 32 MiB so it is safe on v7x (64 MiB physical VMEM).
    per_step = (C * tile_p * 2 +        # x tile, bf16
                Coutp * tile_p * 2 +    # prior tile, bf16
                Coutp * tile_p * 4 +    # out tile, f32
                Coutp * C * 2)          # weight, bf16
    return min(32 * 1024 * 1024, 2 * per_step + 4 * 1024 * 1024)


def fused_bottleneck_nchw(x_bf, w_bf, prior_bf, *, tile_p=None):
    """ReLU(w_bf @ x_bf + prior_bf) computed per image, staying in NCHW layout.

    x_bf: (N, C, P) bf16, w_bf: (Coutp, C) bf16, prior_bf: (N, Coutp, P) bf16.
    Returns (N, Coutp, P) f32."""
    N, C, P = x_bf.shape
    Coutp = w_bf.shape[0]
    if tile_p is None:
        tile_p = _pick_tile_p(P, N)
    assert P % tile_p == 0
    grid = (N, P // tile_p)
    return pl.pallas_call(
        _bottleneck_kernel,
        out_shape=jax.ShapeDtypeStruct((N, Coutp, P), jnp.float32),
        grid_spec=pltpu.PrefetchScalarGridSpec(
            num_scalar_prefetch=0,
            grid=grid,
            in_specs=[
                pl.BlockSpec((Coutp, C), lambda n, p: (0, 0)),
                pl.BlockSpec((None, C, tile_p), lambda n, p: (n, 0, p)),
                pl.BlockSpec((None, Coutp, tile_p), lambda n, p: (n, 0, p)),
            ],
            out_specs=pl.BlockSpec((None, Coutp, tile_p), lambda n, p: (n, 0, p)),
        ),
        compiler_params=pltpu.CompilerParams(
            dimension_semantics=("parallel", "parallel"),
            vmem_limit_bytes=_vmem_limit_bytes(tile_p, C, Coutp),
        ),
    )(w_bf, x_bf, prior_bf)


# ----------------------------------------------------------------------------
# Plain-JAX glue on tiny pooled grids (all heavy tensors are touched only by
# the single prior einsum and the Pallas kernel).
# ----------------------------------------------------------------------------
def _adaptive_pool_matrix(out_size, in_size):
    """Row matrix implementing torch AdaptiveAvgPool bin boundaries (1-D)."""
    M = np.zeros((out_size, in_size), np.float32)
    for i in range(out_size):
        lo = (i * in_size) // out_size
        hi = -(-((i + 1) * in_size) // out_size)
        M[i, lo:hi] = 1.0 / (hi - lo)
    return jnp.asarray(M)


def _bilinear_matrix(out_size, in_size):
    """Interp matrix for F.interpolate(mode='bilinear', align_corners=False)."""
    M = np.zeros((out_size, in_size), np.float32)
    scale = in_size / out_size
    for o in range(out_size):
        src = max((o + 0.5) * scale - 0.5, 0.0)
        i0 = min(int(math.floor(src)), in_size - 1)
        i1 = min(i0 + 1, in_size - 1)
        lam = src - i0
        M[o, i0] += 1.0 - lam
        M[o, i1] += lam
    return jnp.asarray(M)


def _build_prior_bf16(feats_bf, Wb, b, stage_weights, sizes):
    """prior[n,o,h,w] = bias[o] + sum_s bilinear_up(stage_s conv folded with its
    bottleneck slice)[n,o,h,w], built as one low-rank contraction.

    The single full-resolution einsum's natural dot output order is already
    (n,o,h,w), so the big tensor is written exactly once, in bf16."""
    N, C, H, W = feats_bf.shape
    Coutp = Wb.shape[0]
    t_slabs, mw_cols = [], []
    for idx, (s, w_stage) in enumerate(zip(sizes, stage_weights)):
        Ph = _adaptive_pool_matrix(s, H).astype(jnp.bfloat16)
        Pw = _adaptive_pool_matrix(s, W).astype(jnp.bfloat16)
        pooled = jnp.einsum("kh,lw,nchw->nckl", Ph, Pw, feats_bf,
                            preferred_element_type=jnp.float32)        # (N,C,s,s)
        w_eff = Wb[:, idx * C:(idx + 1) * C] @ w_stage                  # (Coutp,C)
        contrib = jnp.einsum("oc,nckl->nokl", w_eff, pooled)            # (N,Coutp,s,s)
        t_slabs.append(jnp.einsum("hk,nokl->nohl",
                                  _bilinear_matrix(H, s), contrib))     # (N,Coutp,H,s)
        mw_cols.append(_bilinear_matrix(W, s))                          # (W,s)
    # extra rank-1 slot carrying the bottleneck bias (folds the bias add).
    t_slabs.append(jnp.broadcast_to(b[None, :, None, None], (N, Coutp, H, 1)))
    mw_cols.append(jnp.ones((W, 1), jnp.float32))
    t_all = jnp.concatenate(t_slabs, axis=-1).astype(jnp.bfloat16)      # (N,Coutp,H,L+1)
    mw_all = jnp.concatenate(mw_cols, axis=-1).astype(jnp.bfloat16)     # (W,L+1)
    prior = jnp.einsum("nohl,wl->nohw", t_all, mw_all)                  # (N,Coutp,H,W) bf16
    return prior.reshape(N, Coutp, H * W)


def pixel_encoder_forward(feats, params, sizes):
    """feats: (N, C, H, W) f32 -> (N, out_features, H, W) f32 (NCHW like torch)."""
    N, C, H, W = feats.shape
    Wb = params["bottleneck_w"]                 # (Cout, (len(sizes)+1)*C), torch layout
    b = params["bottleneck_b"]                  # (Cout,)
    Cout = Wb.shape[0]
    Coutp = _round_up(Cout, 128)                # lane-dense Cout; no padding beyond 128
    if Coutp != Cout:
        Wb = jnp.pad(Wb, ((0, Coutp - Cout), (0, 0)))
        b = jnp.pad(b, (0, Coutp - Cout))

    feats_bf = feats.astype(jnp.bfloat16)       # single cast pass, reused below
    prior = _build_prior_bf16(feats_bf, Wb, b, params["stage_weights"], sizes)
    w_feats = Wb[:, len(sizes) * C:].astype(jnp.bfloat16)   # (Coutp, C), no transpose
    x_flat = feats_bf.reshape(N, C, H * W)                  # free reshape, stays NCHW
    out = fused_bottleneck_nchw(x_flat, w_feats, prior)     # (N, Coutp, H*W) f32
    return out[:, :Cout, :].reshape(N, Cout, H, W)


def init_params(key, features, out_features, sizes):
    """Weights kept in PyTorch (out_ch, in_ch) layout."""
    ks = jax.random.split(key, len(sizes) + 2)
    stage_weights = [
        0.1 * jax.random.normal(ks[i], (features, features), jnp.float32)
        for i in range(len(sizes))
    ]
    cin = features * (len(sizes) + 1)
    bottleneck_w = 0.1 * jax.random.normal(ks[-2], (out_features, cin), jnp.float32)
    bottleneck_b = 0.1 * jax.random.normal(ks[-1], (out_features,), jnp.float32)
    return {"stage_weights": stage_weights,
            "bottleneck_w": bottleneck_w,
            "bottleneck_b": bottleneck_b}


if __name__ == "__main__":
    # Small shapes consistent with the module (sizes=(1,2,3,6) needs H,W >= 6);
    # out_features=128 is the module default (lane-dense Cout).
    N, FEATURES, OUT_FEATURES = 2, 16, 128
    H = W = 12
    SIZES = (1, 2, 3, 6)

    key = jax.random.PRNGKey(0)
    k_x, k_p = jax.random.split(key)
    feats = jax.random.normal(k_x, (N, FEATURES, H, W), jnp.float32)
    params = init_params(k_p, FEATURES, OUT_FEATURES, SIZES)

    fwd = jax.jit(pixel_encoder_forward, static_argnames=("sizes",))
    out = jax.block_until_ready(fwd(feats, params, sizes=SIZES))
    assert out.shape == (N, OUT_FEATURES, H, W)

    # Reference: the literal PyTorch computation (pool -> stage conv ->
    # upsample -> concat -> bottleneck -> ReLU), all in f32 NCHW.
    def adaptive_avg_pool_nchw(x, out_size):
        _, _, Hh, Ww = x.shape

        def bounds(n_in, n_out):
            return ([(i * n_in) // n_out for i in range(n_out)],
                    [-(-((i + 1) * n_in) // n_out) for i in range(n_out)])

        hs, he = bounds(Hh, out_size)
        ws, we = bounds(Ww, out_size)
        rows = []
        for i in range(out_size):
            cols = [x[:, :, hs[i]:he[i], ws[j]:we[j]].mean(axis=(2, 3))
                    for j in range(out_size)]
            rows.append(jnp.stack(cols, axis=-1))        # (N, C, out)
        return jnp.stack(rows, axis=-2)                  # (N, C, out, out)

    cat = []
    for s, w_stage in zip(SIZES, params["stage_weights"]):
        pooled = adaptive_avg_pool_nchw(feats, s)                     # (N,C,s,s)
        conv = jnp.einsum("oc,nckl->nokl", w_stage, pooled)           # (N,C,s,s)
        up = jnp.einsum("hk,wl,nokl->nohw",
                        _bilinear_matrix(H, s), _bilinear_matrix(W, s), conv)
        cat.append(up)
    cat.append(feats)
    cat = jnp.concatenate(cat, axis=1)                                # (N,5C,H,W)
    ref = jnp.maximum(
        jnp.einsum("oc,nchw->nohw", params["bottleneck_w"], cat)
        + params["bottleneck_b"][None, :, None, None], 0.0)

    # bf16 operands (x, weights, prior storage) vs. the f32 reference.
    np.testing.assert_allclose(np.asarray(out), np.asarray(ref),
                               rtol=2e-2, atol=2e-2)

    print("KERNEL_OK")
</pallas_src>

<mosaic_0001>
module attributes {stable_mosaic.version = 11 : i64} {
  func.func @_bottleneck_kernel(%arg0: i32, %arg1: i32, %arg2: memref<128x16xbf16, #tpu.memory_space<vmem>>, %arg3: memref<1x16x144xbf16, #tpu.memory_space<vmem>>, %arg4: memref<1x128x144xbf16, #tpu.memory_space<vmem>>, %arg5: memref<1x128x144xf32, #tpu.memory_space<vmem>>) attributes {dimension_semantics = [#tpu.dimension_semantics<parallel>, #tpu.dimension_semantics<parallel>], iteration_bounds = array<i64: 2, 1>, scalar_prefetch = 0 : i64, scratch_operands = 0 : i64, tpu.core_type = #tpu.core_type<tc>, window_params = [{pipeline_mode = #tpu.pipeline_mode<synchronous>, transform_indices = @transform_0, window_bounds = array<i64: 128, 16>}, {transform_indices = @transform_1, window_bounds = array<i64: 1, 16, 144>}, {transform_indices = @transform_2, window_bounds = array<i64: 1, 128, 144>}, {transform_indices = @transform_3, window_bounds = array<i64: 1, 128, 144>}]} {
    %c0 = arith.constant 0 : index
    %c0_0 = arith.constant 0 : index
    %0 = vector.load %arg2[%c0, %c0_0] : memref<128x16xbf16, #tpu.memory_space<vmem>>, vector<128x16xbf16>
    %c0_1 = arith.constant 0 : index
    %c0_2 = arith.constant 0 : index
    %c0_3 = arith.constant 0 : index
    %1 = vector.load %arg3[%c0_1, %c0_2, %c0_3] : memref<1x16x144xbf16, #tpu.memory_space<vmem>>, vector<1x16x144xbf16>
    %2 = vector.shape_cast %1 : vector<1x16x144xbf16> to vector<16x144xbf16>
    %cst = arith.constant dense<0.000000e+00> : vector<128x144xf32>
    %3 = tpu.matmul %0, %2, %cst {dimension_numbers = #tpu.dot_dimension_numbers<[1], [0], [0], [1], [0, 0, 1, 1], [], []>} : vector<128x16xbf16>, vector<16x144xbf16>, vector<128x144xf32> -> vector<128x144xf32>
    %c0_4 = arith.constant 0 : index
    %c0_5 = arith.constant 0 : index
    %c0_6 = arith.constant 0 : index
    %4 = vector.load %arg4[%c0_4, %c0_5, %c0_6] : memref<1x128x144xbf16, #tpu.memory_space<vmem>>, vector<1x128x144xbf16>
    %5 = vector.shape_cast %4 : vector<1x128x144xbf16> to vector<128x144xbf16>
    %6 = arith.extf %5 : vector<128x144xbf16> to vector<128x144xf32>
    %7 = arith.addf %3, %6 : vector<128x144xf32>
    %cst_7 = arith.constant 0.000000e+00 : f32
    %8 = vector.broadcast %cst_7 : f32 to vector<128x144xf32>
    %9 = arith.maximumf %7, %8 : vector<128x144xf32>
    %c0_8 = arith.constant 0 : index
    %c0_9 = arith.constant 0 : index
    %c0_10 = arith.constant 0 : index
    %10 = vector.load %arg5[%c0_8, %c0_9, %c0_10] : memref<1x128x144xf32, #tpu.memory_space<vmem>>, vector<1x128x144xf32>
    %11 = vector.shape_cast %10 : vector<1x128x144xf32> to vector<128x144xf32>
    %12 = vector.shape_cast %9 : vector<128x144xf32> to vector<1x128x144xf32>
    tpu.vector_store %arg5[%c0_8, %c0_9, %c0_10], %12 {strides = array<i32>} : memref<1x128x144xf32, #tpu.memory_space<vmem>>, vector<1x128x144xf32>,
    return
  }
  func.func @transform_0(%arg0: i32, %arg1: i32) -> (i32, i32) {
    %c0_i32 = arith.constant 0 : i32
    %c0_i32_0 = arith.constant 0 : i32
    %c0_i32_1 = arith.constant 0 : i32
    return %c0_i32, %c0_i32_0 : i32, i32
  }
  func.func @transform_1(%arg0: i32, %arg1: i32) -> (i32, i32, i32) {
    %c0_i32 = arith.constant 0 : i32
    %c0_i32_0 = arith.constant 0 : i32
    return %arg0, %c0_i32, %arg1 : i32, i32, i32
  }
  func.func @transform_2(%arg0: i32, %arg1: i32) -> (i32, i32, i32) {
    %c0_i32 = arith.constant 0 : i32
    %c0_i32_0 = arith.constant 0 : i32
    return %arg0, %c0_i32, %arg1 : i32, i32, i32
  }
  func.func @transform_3(%arg0: i32, %arg1: i32) -> (i32, i32, i32) {
    %c0_i32 = arith.constant 0 : i32
    %c0_i32_0 = arith.constant 0 : i32
    return %arg0, %c0_i32, %arg1 : i32, i32, i32
  }
}

</mosaic_0001>

<bundles_post_ra>
// kernel: pixel_encoder_forward.1
= control target key start
LH: loop header
LB: loop body
LE: loop exit
PB: predicated region body
PF: predicated region fallthrough
CT: control target
= control target key end

     0   :  { %s787_s12 = smov 0   ;;  %s789_s13 = smov 0   ;;  %s928_s0 = inlined_call_operand.vmem [shape: bf16[128,16], index: 0, kind: input, shape index: {}]   ;;  %s929_s1 = inlined_call_operand.vmem [shape: bf16[2,16,144], index: 1, kind: input, shape index: {}]   ;;  %s930_s2 = inlined_call_operand.vmem [shape: bf16[2,128,144], index: 2, kind: input, shape index: {}]   ;;  %s931_s3 = inlined_call_operand.vmem [shape: f32[2,128,144], index: 3, kind: output, shape index: {}]  }
   0x1   :  { %s791_s14 = smov 0  }
   0x2 LB: > { %s25_s15 = sadd.s32 1, %s760_s13  ;;  %p674_p0 = scmp.ge.s32.totalorder %s764_s14, 1  ;;  %s764_s14 = sphi %s791_s14, %s13_s14   ;;  %s760_s13 = sphi %s789_s13, %s933_s13   ;;  %s756_s12 = sphi %s787_s12, %s932_s12  }
   0x3   : > { %p27_p1 = scmp.ge.s32.totalorder %s25_s15, 2  ;;  %p175_p2 = scmp.lt.s32.totalorder %s764_s14, 3 }
   0x5   : > { %s935_s15 = smov (%p27_p1, %s25_s15), 0  ;;  %p176_p3 = pnand %p674_p0, %p175_p2 }
   0x6   : > { %p217_p4 = scmp.lt.s32.totalorder (!%p176_p3), %s756_s12, 1 }
   0x7   : > { %179 = sbr.rel (%p176_p3) target bundleno = 248 (0xf8), region = 32 }
   0xc   : > { %v766_v0 = vmov 0   ;;  %s937_s12 = smov (!%p217_p4, %s756_s12), 1  ;;  %v734_v3 = vld [vmem:[%s928_s0] sm:$0xff]   ;;  %vm363_vm0 = vcmask 130048   ;;  %v736_v5 = vld [vmem:[%s928_s0 + $0x8] sm:$0xff]   ;;  %v738_v7 = vld [vmem:[%s928_s0 + $0x10] sm:$0xff]  }
   0xd   : > { %420 = vmatprep.mubr.bf16.mxu0 %v766_v0  ;;  %460 = vmatprep.mubr.bf16.mxu1 %v766_v0  ;;  %s701_s16 = sshll.u32 %s937_s12, 4  ;;  %v735_v4 = vld [vmem:[%s928_s0 + $0x20] sm:$0xff]   ;;  %v737_v6 = vld [vmem:[%s928_s0 + $0x28] sm:$0xff]   ;;  %v739_v8 = vld [vmem:[%s928_s0 + $0x30] sm:$0xff]   ;;  %s702_s9 = sshll.u32 %s937_s12, 7 }
   0xe   : > { %s224_s19 = scalar_lea.vmem %s929_s1, %s701_s16  ;;  %v740_v9 = vld [vmem:[%s928_s0 + $0x18] sm:$0xff]   ;;  %s847_s16 = scalar_lea.vmem %s930_s2, %s702_s9 }
   0xf   : > { %v731_v1 = vld [vmem:[%s224_s19 + $0x4] ss:$8 sps:$4 sm:$0xff]   ;;  %v733_v2 = vld [vmem:[%s224_s19] ss:$8 sps:$4 sm:$0xff]   ;;  %v741_v10 = vld [vmem:[%s928_s0 + $0x38] sm:$0xff]   ;;  %s703_s17 = sshll.u32 %s937_s12, 8 }
  0x10   : > { %402 = vmatprep.subr.bf16.mxu0 %v731_v1  ;;  %704 = vmatprep.subr.bf16.mxu1 %v731_v1  ;;  %v265_v11 = vld [vmem:[%s847_s16] sm:$0xff]  ;;  %v266_v15 = vld [vmem:[%s847_s16 + $0x8] sm:$0xff]  ;;  %v267_v25 = vld [vmem:[%s847_s16 + $0x10] sm:$0xff]  ;;  %s859_s20 = scalar_lea.vmem %s931_s3, %s703_s17 }
  0x11   : > { %403 = vmatpush1.bf16.msra.mxu0 %v733_v2  ;;  %705 = vmatpush1.bf16.msra.mxu1 %v733_v2  ;;  %v273_v12 = vld [vmem:[%s847_s16 + $0x40] sm:$0xff]  ;;  %v281_v13 = vunpack.c.l.bf16 %v265_v11  ;;  %v274_v16 = vld [vmem:[%s847_s16 + $0x48] sm:$0xff]  ;;  %v282_v17 = vunpack.c.h.bf16 %v265_v11  ;;  %v283_v23 = vunpack.c.l.bf16 %v266_v15  ;;  %v275_v26 = vld [vmem:[%s847_s16 + $0x50] sm:$0xff]  ;;  %v284_v29 = vunpack.c.h.bf16 %v266_v15 }
  0x12   : > { %v297_v14 = vunpack.c.l.bf16 %v273_v12  ;;  %v298_v18 = vunpack.c.h.bf16 %v273_v12  ;;  %v299_v24 = vunpack.c.l.bf16 %v274_v16  ;;  %v300_v30 = vunpack.c.h.bf16 %v274_v16  ;;  %v268_v43 = vld [vmem:[%s847_s16 + $0x18] sm:$0xff]  ;;  %v269_v61 = vld [vmem:[%s847_s16 + $0x20] sm:$0xff]  ;;  %v270_v15 = vld [vmem:[%s847_s16 + $0x28] sm:$0xff] }
  0x13   : > { %v285_v37 = vunpack.c.l.bf16 %v267_v25  ;;  %v301_v38 = vunpack.c.l.bf16 %v275_v26  ;;  %v276_v44 = vld [vmem:[%s847_s16 + $0x58] sm:$0xff]  ;;  %v286_v47 = vunpack.c.h.bf16 %v267_v25  ;;  %v302_v48 = vunpack.c.h.bf16 %v275_v26  ;;  %v277_v62 = vld [vmem:[%s847_s16 + $0x60] sm:$0xff]  ;;  %v278_v16 = vld [vmem:[%s847_s16 + $0x68] sm:$0xff] }
  0x14   : > { %691 = vmatmul.mubr.msk.bf16.vlgmr.msra.gmra.mxu0 %vm363_vm0, %v734_v3  ;;  %695 = vmatmul.mubr.msk.bf16.vlgmr.msra.gmra.mxu1 %vm363_vm0, %v735_v4  ;;  %v287_v55 = vunpack.c.l.bf16 %v268_v43  ;;  %v303_v56 = vunpack.c.l.bf16 %v276_v44  ;;  %v288_v1 = vunpack.c.h.bf16 %v268_v43  ;;  %v304_v2 = vunpack.c.h.bf16 %v276_v44 }
  0x15   : > { %430 = vmatprep.mubr.bf16.mxu0 %v766_v0  ;;  %470 = vmatprep.mubr.bf16.mxu1 %v766_v0 }
  0x1c   : > { %692 = vmatmul.mubr.msk.bf16.gmra.mxu0 %vm363_vm0, %v736_v5  ;;  %696 = vmatmul.mubr.msk.bf16.gmra.mxu1 %vm363_vm0, %v737_v6 }
  0x1d   : > { %440 = vmatprep.mubr.bf16.mxu0 %v766_v0  ;;  %480 = vmatprep.mubr.bf16.mxu1 %v766_v0 }
  0x24   : > { %693 = vmatmul.mubr.msk.bf16.gmra.mxu0 %vm363_vm0, %v738_v7  ;;  %697 = vmatmul.mubr.msk.bf16.gmra.mxu1 %vm363_vm0, %v739_v8 }
  0x25   : > { %450 = vmatprep.mubr.bf16.mxu0 %v766_v0  ;;  %490 = vmatprep.mubr.bf16.mxu1 %v766_v0 }
  0x2c   : > { %694 = vmatmul.mubr.msk.bf16.gmra.mxu0 %vm363_vm0, %v740_v9  ;;  %698 = vmatmul.mubr.msk.bf16.gmra.mxu1 %vm363_vm0, %v741_v10  ;;  %v289_v9 = vunpack.c.l.bf16 %v269_v61  ;;  %v305_v10 = vunpack.c.l.bf16 %v277_v62 }
  0xd4   : > { %v422_v19 = vpop.f32.mrf.mxu0  ;;  %v462_v20 = vpop.f32.mrf.mxu1 }
  0xd5   : > { %v423_v21 = vadd.f32 %v422_v19, %v281_v13  ;;  %v463_v22 = vadd.f32 %v462_v20, %v297_v14  ;;  %v290_v19 = vunpack.c.h.bf16 %v269_v61  ;;  %v306_v20 = vunpack.c.h.bf16 %v277_v62 }
  0xd6   : > { %v424_v27 = vpop.f32.mrf.mxu0  ;;  %v464_v28 = vpop.f32.mrf.mxu1 }
  0xd7   : > { %v501_v31 = vmax.f32 %v423_v21, 0.0  ;;  %v517_v32 = vmax.f32 %v463_v22, 0.0  ;;  %v425_v33 = vadd.f32 %v424_v27, %v282_v17  ;;  %v465_v34 = vadd.f32 %v464_v28, %v298_v18 }
  0xd8   : > { %v426_v35 = vpop.f32.mrf.mxu0  ;;  %v466_v36 = vpop.f32.mrf.mxu1  ;;  %v291_v27 = vunpack.c.l.bf16 %v270_v15  ;;  %v307_v28 = vunpack.c.l.bf16 %v278_v16 }
  0xd9   : > { %533 = vst [vmem:[%s859_s20] sm:$0xff] %v501_v31  ;;  %549 = vst [vmem:[%s859_s20 + $0x80] sm:$0xff] %v517_v32  ;;  %v502_v39 = vmax.f32 %v425_v33, 0.0  ;;  %v518_v40 = vmax.f32 %v465_v34, 0.0  ;;  %v427_v41 = vadd.f32 %v426_v35, %v283_v23  ;;  %v467_v42 = vadd.f32 %v466_v36, %v299_v24  ;;  %v271_v33 = vld [vmem:[%s847_s16 + $0x30] sm:$0xff] }
  0xda   : > { %v428_v45 = vpop.f32.mrf.mxu0  ;;  %v468_v46 = vpop.f32.mrf.mxu1  ;;  %v279_v34 = vld [vmem:[%s847_s16 + $0x70] sm:$0xff] }
  0xdb   : > { %534 = vst.msk [vmem:[%s859_s20 + $0x8] sm:$0xff] %vm363_vm0, %v502_v39  ;;  %550 = vst.msk [vmem:[%s859_s20 + $0x88] sm:$0xff] %vm363_vm0, %v518_v40  ;;  %v503_v49 = vmax.f32 %v427_v41, 0.0  ;;  %v519_v50 = vmax.f32 %v467_v42, 0.0  ;;  %v429_v51 = vadd.f32 %v428_v45, %v284_v29  ;;  %v469_v52 = vadd.f32 %v468_v46, %v300_v30 }
  0xdc   : > { %v432_v53 = vpop.f32.mrf.mxu0  ;;  %v472_v54 = vpop.f32.mrf.mxu1  ;;  %v293_v45 = vunpack.c.l.bf16 %v271_v33  ;;  %v309_v46 = vunpack.c.l.bf16 %v279_v34 }
  0xdd   : > { %535 = vst [vmem:[%s859_s20 + $0x10] sm:$0xff] %v503_v49  ;;  %551 = vst [vmem:[%s859_s20 + $0x90] sm:$0xff] %v519_v50  ;;  %v504_v57 = vmax.f32 %v429_v51, 0.0  ;;  %v520_v58 = vmax.f32 %v469_v52, 0.0  ;;  %v433_v59 = vadd.f32 %v432_v53, %v285_v37  ;;  %v473_v60 = vadd.f32 %v472_v54, %v301_v38  ;;  %v272_v51 = vld [vmem:[%s847_s16 + $0x38] sm:$0xff] }
  0xde   : > { %v434_v63 = vpop.f32.mrf.mxu0  ;;  %v474_v0 = vpop.f32.mrf.mxu1  ;;  %v292_v37 = vunpack.c.h.bf16 %v270_v15  ;;  %v308_v38 = vunpack.c.h.bf16 %v278_v16  ;;  %v280_v52 = vld [vmem:[%s847_s16 + $0x78] sm:$0xff] }
  0xdf   : > { %536 = vst.msk [vmem:[%s859_s20 + $0x18] sm:$0xff] %vm363_vm0, %v504_v57  ;;  %552 = vst.msk [vmem:[%s859_s20 + $0x98] sm:$0xff] %vm363_vm0, %v520_v58  ;;  %v505_v3 = vmax.f32 %v433_v59, 0.0  ;;  %v521_v4 = vmax.f32 %v473_v60, 0.0  ;;  %v435_v5 = vadd.f32 %v434_v63, %v286_v47  ;;  %v475_v6 = vadd.f32 %v474_v0, %v302_v48 }
  0xe0   : > { %v436_v7 = vpop.f32.mrf.mxu0  ;;  %v476_v8 = vpop.f32.mrf.mxu1  ;;  %v295_v63 = vunpack.c.l.bf16 %v272_v51  ;;  %v311_v0 = vunpack.c.l.bf16 %v280_v52 }
  0xe1   : > { %537 = vst [vmem:[%s859_s20 + $0x20] sm:$0xff] %v505_v3  ;;  %553 = vst [vmem:[%s859_s20 + $0xa0] sm:$0xff] %v521_v4  ;;  %v506_v11 = vmax.f32 %v435_v5, 0.0  ;;  %v522_v12 = vmax.f32 %v475_v6, 0.0  ;;  %v437_v13 = vadd.f32 %v436_v7, %v287_v55  ;;  %v477_v14 = vadd.f32 %v476_v8, %v303_v56 }
  0xe2   : > { %v438_v17 = vpop.f32.mrf.mxu0  ;;  %v478_v18 = vpop.f32.mrf.mxu1  ;;  %v294_v55 = vunpack.c.h.bf16 %v271_v33  ;;  %v310_v56 = vunpack.c.h.bf16 %v279_v34  ;;  %v296_v7 = vunpack.c.h.bf16 %v272_v51  ;;  %v312_v8 = vunpack.c.h.bf16 %v280_v52 }
  0xe3   : > { %538 = vst.msk [vmem:[%s859_s20 + $0x28] sm:$0xff] %vm363_vm0, %v506_v11  ;;  %554 = vst.msk [vmem:[%s859_s20 + $0xa8] sm:$0xff] %vm363_vm0, %v522_v12  ;;  %v507_v21 = vmax.f32 %v437_v13, 0.0  ;;  %v523_v22 = vmax.f32 %v477_v14, 0.0  ;;  %v439_v23 = vadd.f32 %v438_v17, %v288_v1  ;;  %v479_v24 = vadd.f32 %v478_v18, %v304_v2 }
  0xe4   : > { %v442_v25 = vpop.f32.mrf.mxu0  ;;  %v482_v26 = vpop.f32.mrf.mxu1 }
  0xe5   : > { %539 = vst [vmem:[%s859_s20 + $0x30] sm:$0xff] %v507_v21  ;;  %555 = vst [vmem:[%s859_s20 + $0xb0] sm:$0xff] %v523_v22  ;;  %v508_v29 = vmax.f32 %v439_v23, 0.0  ;;  %v524_v30 = vmax.f32 %v479_v24, 0.0  ;;  %v443_v31 = vadd.f32 %v442_v25, %v289_v9  ;;  %v483_v32 = vadd.f32 %v482_v26, %v305_v10 }
  0xe6   : > { %v444_v35 = vpop.f32.mrf.mxu0  ;;  %v484_v36 = vpop.f32.mrf.mxu1 }
  0xe7   : > { %540 = vst.msk [vmem:[%s859_s20 + $0x38] sm:$0xff] %vm363_vm0, %v508_v29  ;;  %556 = vst.msk [vmem:[%s859_s20 + $0xb8] sm:$0xff] %vm363_vm0, %v524_v30  ;;  %v509_v39 = vmax.f32 %v443_v31, 0.0  ;;  %v525_v40 = vmax.f32 %v483_v32, 0.0  ;;  %v445_v41 = vadd.f32 %v444_v35, %v290_v19  ;;  %v485_v42 = vadd.f32 %v484_v36, %v306_v20 }
  0xe8   : > { %v446_v43 = vpop.f32.mrf.mxu0  ;;  %v486_v44 = vpop.f32.mrf.mxu1 }
  0xe9   : > { %541 = vst [vmem:[%s859_s20 + $0x40] sm:$0xff] %v509_v39  ;;  %557 = vst [vmem:[%s859_s20 + $0xc0] sm:$0xff] %v525_v40  ;;  %v510_v47 = vmax.f32 %v445_v41, 0.0  ;;  %v526_v48 = vmax.f32 %v485_v42, 0.0  ;;  %v447_v49 = vadd.f32 %v446_v43, %v291_v27  ;;  %v487_v50 = vadd.f32 %v486_v44, %v307_v28 }
  0xea   : > { %v448_v53 = vpop.f32.mrf.mxu0  ;;  %v488_v54 = vpop.f32.mrf.mxu1 }
  0xeb   : > { %542 = vst.msk [vmem:[%s859_s20 + $0x48] sm:$0xff] %vm363_vm0, %v510_v47  ;;  %558 = vst.msk [vmem:[%s859_s20 + $0xc8] sm:$0xff] %vm363_vm0, %v526_v48  ;;  %v511_v57 = vmax.f32 %v447_v49, 0.0  ;;  %v527_v58 = vmax.f32 %v487_v50, 0.0  ;;  %v449_v59 = vadd.f32 %v448_v53, %v292_v37  ;;  %v489_v60 = vadd.f32 %v488_v54, %v308_v38 }
  0xec   : > { %v452_v61 = vpop.f32.mrf.mxu0  ;;  %v492_v62 = vpop.f32.mrf.mxu1 }
  0xed   : > { %543 = vst [vmem:[%s859_s20 + $0x50] sm:$0xff] %v511_v57  ;;  %559 = vst [vmem:[%s859_s20 + $0xd0] sm:$0xff] %v527_v58  ;;  %v512_v1 = vmax.f32 %v449_v59, 0.0  ;;  %v528_v2 = vmax.f32 %v489_v60, 0.0  ;;  %v453_v3 = vadd.f32 %v452_v61, %v293_v45  ;;  %v493_v4 = vadd.f32 %v492_v62, %v309_v46 }
  0xee   : > { %v454_v5 = vpop.f32.mrf.mxu0  ;;  %v494_v6 = vpop.f32.mrf.mxu1 }
  0xef   : > { %544 = vst.msk [vmem:[%s859_s20 + $0x58] sm:$0xff] %vm363_vm0, %v512_v1  ;;  %560 = vst.msk [vmem:[%s859_s20 + $0xd8] sm:$0xff] %vm363_vm0, %v528_v2  ;;  %v513_v9 = vmax.f32 %v453_v3, 0.0  ;;  %v529_v10 = vmax.f32 %v493_v4, 0.0  ;;  %v455_v11 = vadd.f32 %v454_v5, %v294_v55  ;;  %v495_v12 = vadd.f32 %v494_v6, %v310_v56 }
  0xf0   : > { %v456_v13 = vpop.f32.mrf.mxu0  ;;  %v496_v14 = vpop.f32.mrf.mxu1 }
  0xf1   : > { %545 = vst [vmem:[%s859_s20 + $0x60] sm:$0xff] %v513_v9  ;;  %561 = vst [vmem:[%s859_s20 + $0xe0] sm:$0xff] %v529_v10  ;;  %v514_v15 = vmax.f32 %v455_v11, 0.0  ;;  %v530_v16 = vmax.f32 %v495_v12, 0.0  ;;  %v457_v17 = vadd.f32 %v456_v13, %v295_v63  ;;  %v497_v18 = vadd.f32 %v496_v14, %v311_v0 }
  0xf2   : > { %v458_v19 = vpop.f32.mrf.mxu0  ;;  %v498_v20 = vpop.f32.mrf.mxu1 }
  0xf3   : > { %546 = vst.msk [vmem:[%s859_s20 + $0x68] sm:$0xff] %vm363_vm0, %v514_v15  ;;  %562 = vst.msk [vmem:[%s859_s20 + $0xe8] sm:$0xff] %vm363_vm0, %v530_v16  ;;  %v515_v21 = vmax.f32 %v457_v17, 0.0  ;;  %v531_v22 = vmax.f32 %v497_v18, 0.0  ;;  %v459_v23 = vadd.f32 %v458_v19, %v296_v7  ;;  %v499_v24 = vadd.f32 %v498_v20, %v312_v8 }
  0xf5   : > { %547 = vst [vmem:[%s859_s20 + $0x70] sm:$0xff] %v515_v21  ;;  %563 = vst [vmem:[%s859_s20 + $0xf0] sm:$0xff] %v531_v22  ;;  %v516_v25 = vmax.f32 %v459_v23, 0.0  ;;  %v532_v26 = vmax.f32 %v499_v24, 0.0 }
  0xf7   : > { %548 = vst.msk [vmem:[%s859_s20 + $0x78] sm:$0xff] %vm363_vm0, %v516_v25  ;;  %564 = vst.msk [vmem:[%s859_s20 + $0xf8] sm:$0xff] %vm363_vm0, %v532_v26 }
  0xf8 PF: > { %s13_s14 = sadd.s32 1, %s764_s14   ;;  %s932_s12 = smov %s760_s13 }
  0xf9   : > { %p10_p5 = scmp.ge.s32.totalorder %s13_s14, 4   ;;  %s933_s13 = smov %s935_s15 }
  0xfb   :  { %12 = sbr.rel (!%p10_p5) target bundleno = 2 (0x2), region = 65 }

</bundles_post_ra>
